<compile_context>
chip_gen: v6e
topology: v6e:2x2x1
jax: 0.10.0
libtpu: 0.0.40
codegen_flags: <defaults>
</compile_context>

<pallas_src>
import functools

import jax
import jax.numpy as jnp
from jax.experimental import pallas as pl
from jax.experimental.pallas import tpu as pltpu

HIDDEN = 256


def _round_up(x, m):
    return ((x + m - 1) // m) * m


def _choose_tb(B, tb_req):
    """Pick the batch tile.

    - B <= 128: one tile covering the whole (8-rounded) batch; the out block
      equals the full array so the 128-lane alignment rule is trivially met.
    - B > 128: 128-aligned tiles (lane-dense output blocks), capped so the
      grid has at least two steps (v7x megacore), default 1024 rows/step
      (per-step overhead ~0.35 us dominates the ~40 MFLOP of a 256-row tile).
    """
    if B <= 128:
        return _round_up(max(B, 8), 8)
    tb = _round_up(min(max(tb_req, 128), 2048), 128)
    tb = min(tb, _round_up(pl.cdiv(B, 2), 128))
    return tb


def _mlp_kernel(x_ref, w1_ref, w2_ref, bw_ref, b3_ref, o_ref):
    # In-register f32 -> bf16 cast (VPU); avoids a separate XLA cast pass
    # over the activations in HBM.
    x = x_ref[...].astype(jnp.bfloat16)

    b1 = bw_ref[0:1, :]   # (1, 256) f32
    b2 = bw_ref[1:2, :]   # (1, 256) f32
    w3 = bw_ref[2:3, :]   # (1, 256) f32 (~1e-3 scale -> keep f32)

    # Layer 1: (tb, D) @ (D, 256) on the MXU, bf16 inputs, f32 accumulate.
    h1 = jnp.dot(x, w1_ref[...], preferred_element_type=jnp.float32)
    h1 = jnp.maximum(h1 + b1, 0.0)

    # Layer 2: (tb, 256) @ (256, 256) on the MXU, bf16 inputs, f32 accumulate.
    h2 = jnp.dot(h1.astype(jnp.bfloat16), w2_ref[...],
                 preferred_element_type=jnp.float32)
    h2 = jnp.maximum(h2 + b2, 0.0)

    # Layer 3: 256 -> 1. VPU multiply + XLU cross-lane reduce; the result is
    # written lane-dense as a (1, tb) row (full-width vector stores).
    v = jnp.sum(h2 * w3, axis=-1) + b3_ref[0]          # (tb,) f32
    o_ref[...] = v.reshape(1, -1).astype(o_ref.dtype)  # (1, tb)


@functools.partial(jax.jit, static_argnames=("tb",))
def v_value_net_forward(s, params, *, tb=1024):
    """s: (B, input_dim) float32. Returns (B, 1) float32.

    params = (w1_bf16, w2_bf16, bw_f32, b3_f32) with
      w1: (input_dim, 256) bf16, w2: (256, 256) bf16,
      bw: (3, 256) f32 rows = [b1, b2, w3_row], b3: (1,) f32.
    """
    w1, w2, bw, b3 = params
    B, D = s.shape
    H = w1.shape[1]

    tb_eff = _choose_tb(B, tb)
    num_tiles = pl.cdiv(B, tb_eff)
    b_pad = num_tiles * tb_eff

    out = pl.pallas_call(
        _mlp_kernel,
        out_shape=jax.ShapeDtypeStruct((1, b_pad), jnp.float32),
        grid=(num_tiles,),
        in_specs=[
            # Activations: one batch tile per grid step (f32, cast in-kernel).
            pl.BlockSpec((tb_eff, D), lambda i: (i, 0)),
            # Weights / packed biases: constant index_map -> VMEM-resident.
            pl.BlockSpec((D, H), lambda i: (0, 0)),
            pl.BlockSpec((H, H), lambda i: (0, 0)),
            pl.BlockSpec((3, H), lambda i: (0, 0)),
            # Final bias: single scalar in SMEM (1-D, no padded 2-D block).
            pl.BlockSpec(memory_space=pltpu.SMEM),
        ],
        # Lane-dense output slab: block (1, tb) at block index (0, i).
        out_specs=pl.BlockSpec((1, tb_eff), lambda i: (0, i)),
        compiler_params=pltpu.CompilerParams(
            dimension_semantics=("parallel",)),
    )(s, w1, w2, bw, b3)

    # Slice off padded batch rows and restore the (B, 1) column shape.
    return out[0, :B][:, None]


def init_params(key, input_dim, hidden=HIDDEN):
    """Deterministic init mimicking nn.Linear defaults; l3 uses U(-0.003, 0.003).

    Weights are stored pre-transposed; w1/w2 are pre-cast to bf16 once here
    (instead of on every forward call); b1/b2/w3 are packed into one (3, H)
    f32 operand; b3 is a 1-D (1,) f32 scalar.
    """
    k1, k2, k3, k4, k5, k6 = jax.random.split(key, 6)
    bound1 = 1.0 / jnp.sqrt(input_dim)
    bound2 = 1.0 / jnp.sqrt(hidden)
    w1 = jax.random.uniform(k1, (input_dim, hidden), jnp.float32, -bound1, bound1)
    b1 = jax.random.uniform(k2, (hidden,), jnp.float32, -bound1, bound1)
    w2 = jax.random.uniform(k3, (hidden, hidden), jnp.float32, -bound2, bound2)
    b2 = jax.random.uniform(k4, (hidden,), jnp.float32, -bound2, bound2)
    w3 = jax.random.uniform(k5, (hidden,), jnp.float32, -0.003, 0.003)
    b3 = jax.random.uniform(k6, (1,), jnp.float32, -0.003, 0.003)
    bw = jnp.stack([b1, b2, w3], axis=0)  # (3, hidden) f32
    return (w1.astype(jnp.bfloat16), w2.astype(jnp.bfloat16), bw, b3)


def _reference(s, params):
    """Plain-JAX reference using the same bf16-input / f32-accumulate recipe."""
    w1, w2, bw, b3 = params
    b1, b2, w3 = bw[0], bw[1], bw[2]
    h1 = jnp.dot(s.astype(jnp.bfloat16), w1, preferred_element_type=jnp.float32)
    h1 = jnp.maximum(h1 + b1, 0.0)
    h2 = jnp.dot(h1.astype(jnp.bfloat16), w2, preferred_element_type=jnp.float32)
    h2 = jnp.maximum(h2 + b2, 0.0)
    return (jnp.sum(h2 * w3, axis=-1) + b3[0])[:, None]


# TODO(synk): the module's MSELoss/Adam training utilities (get_loss, optimizer)
# are host-side training code, not part of the forward pass, and are not ported.

if __name__ == "__main__":
    key = jax.random.PRNGKey(0)
    kp, kx1, kx2 = jax.random.split(key, 3)

    input_dim = 32  # small state dim for the value network
    params = init_params(kp, input_dim)

    # Case 1: tiny batch -> single tile covering the batch.
    s_small = jax.random.normal(kx1, (8, input_dim), jnp.float32)
    out_small = v_value_net_forward(s_small, params)
    jax.block_until_ready(out_small)
    ref_small = _reference(s_small, params)
    assert out_small.shape == (8, 1)
    assert jnp.allclose(out_small, ref_small, atol=2e-3, rtol=2e-3)

    # Case 2: batch not divisible by the tile -> exercises the multi-step grid
    # (>= 2 steps for v7x megacore) and the ragged-last-tile path.
    s_big = jax.random.normal(kx2, (200, input_dim), jnp.float32)
    out_big = v_value_net_forward(s_big, params)
    jax.block_until_ready(out_big)
    ref_big = _reference(s_big, params)
    assert out_big.shape == (200, 1)
    assert jnp.allclose(out_big, ref_big, atol=2e-3, rtol=2e-3)

    print("KERNEL_OK")
</pallas_src>

<mosaic_0001>
module attributes {stable_mosaic.version = 11 : i64} {
  func.func @_mlp_kernel(%arg0: i32, %arg1: memref<8x32xf32, #tpu.memory_space<vmem>>, %arg2: memref<32x256xbf16, #tpu.memory_space<vmem>>, %arg3: memref<256x256xbf16, #tpu.memory_space<vmem>>, %arg4: memref<3x256xf32, #tpu.memory_space<vmem>>, %arg5: memref<1xf32, #tpu.memory_space<smem>>, %arg6: memref<1x8xf32, #tpu.memory_space<vmem>>) attributes {dimension_semantics = [#tpu.dimension_semantics<parallel>], iteration_bounds = array<i64: 1>, scalar_prefetch = 0 : i64, scratch_operands = 0 : i64, tpu.core_type = #tpu.core_type<tc>, window_params = [{transform_indices = @transform_0, window_bounds = array<i64: 8, 32>}, {pipeline_mode = #tpu.pipeline_mode<synchronous>, transform_indices = @transform_1, window_bounds = array<i64: 32, 256>}, {pipeline_mode = #tpu.pipeline_mode<synchronous>, transform_indices = @transform_2, window_bounds = array<i64: 256, 256>}, {pipeline_mode = #tpu.pipeline_mode<synchronous>, transform_indices = @transform_3, window_bounds = array<i64: 3, 256>}, {transform_indices = @transform_4, window_bounds = array<i64: 1>}, {transform_indices = @transform_5, window_bounds = array<i64: 1, 8>}]} {
    %c0 = arith.constant 0 : index
    %c0_0 = arith.constant 0 : index
    %0 = vector.load %arg1[%c0, %c0_0] : memref<8x32xf32, #tpu.memory_space<vmem>>, vector<8x32xf32>
    %1 = arith.truncf %0 : vector<8x32xf32> to vector<8x32xbf16>
    %c0_1 = arith.constant 0 : index
    %c0_2 = arith.constant 0 : index
    %2 = vector.load %arg4[%c0_1, %c0_2] : memref<3x256xf32, #tpu.memory_space<vmem>>, vector<1x256xf32>
    %c1 = arith.constant 1 : index
    %c0_3 = arith.constant 0 : index
    %3 = vector.load %arg4[%c1, %c0_3] : memref<3x256xf32, #tpu.memory_space<vmem>>, vector<1x256xf32>
    %c2 = arith.constant 2 : index
    %c0_4 = arith.constant 0 : index
    %4 = vector.load %arg4[%c2, %c0_4] : memref<3x256xf32, #tpu.memory_space<vmem>>, vector<1x256xf32>
    %c0_5 = arith.constant 0 : index
    %c0_6 = arith.constant 0 : index
    %5 = vector.load %arg2[%c0_5, %c0_6] : memref<32x256xbf16, #tpu.memory_space<vmem>>, vector<32x256xbf16>
    %cst = arith.constant dense<0.000000e+00> : vector<8x256xf32>
    %6 = tpu.matmul %1, %5, %cst {dimension_numbers = #tpu.dot_dimension_numbers<[1], [0], [0], [1], [0, 0, 1, 1], [], []>} : vector<8x32xbf16>, vector<32x256xbf16>, vector<8x256xf32> -> vector<8x256xf32>
    %7 = vector.broadcast %2 : vector<1x256xf32> to vector<8x256xf32>
    %8 = arith.addf %6, %7 : vector<8x256xf32>
    %cst_7 = arith.constant 0.000000e+00 : f32
    %9 = vector.broadcast %cst_7 : f32 to vector<8x256xf32>
    %10 = arith.maximumf %8, %9 : vector<8x256xf32>
    %11 = arith.truncf %10 : vector<8x256xf32> to vector<8x256xbf16>
    %c0_8 = arith.constant 0 : index
    %c0_9 = arith.constant 0 : index
    %12 = vector.load %arg3[%c0_8, %c0_9] : memref<256x256xbf16, #tpu.memory_space<vmem>>, vector<256x256xbf16>
    %cst_10 = arith.constant dense<0.000000e+00> : vector<8x256xf32>
    %13 = tpu.matmul %11, %12, %cst_10 {dimension_numbers = #tpu.dot_dimension_numbers<[1], [0], [0], [1], [0, 0, 1, 1], [], []>} : vector<8x256xbf16>, vector<256x256xbf16>, vector<8x256xf32> -> vector<8x256xf32>
    %14 = vector.broadcast %3 : vector<1x256xf32> to vector<8x256xf32>
    %15 = arith.addf %13, %14 : vector<8x256xf32>
    %cst_11 = arith.constant 0.000000e+00 : f32
    %16 = vector.broadcast %cst_11 : f32 to vector<8x256xf32>
    %17 = arith.maximumf %15, %16 : vector<8x256xf32>
    %18 = vector.broadcast %4 : vector<1x256xf32> to vector<8x256xf32>
    %19 = arith.mulf %17, %18 : vector<8x256xf32>
    %cst_12 = arith.constant dense<0.000000e+00> : vector<8xf32>
    %20 = vector.multi_reduction <add>, %19, %cst_12 [1] : vector<8x256xf32> to vector<8xf32>
    %c0_13 = arith.constant 0 : index
    %21 = memref.load %arg5[%c0_13] : memref<1xf32, #tpu.memory_space<smem>>
    %22 = vector.broadcast %21 : f32 to vector<8xf32>
    %23 = arith.addf %20, %22 : vector<8xf32>
    %24 = vector.shape_cast %23 : vector<8xf32> to vector<1x8xf32>
    %c0_14 = arith.constant 0 : index
    %c0_15 = arith.constant 0 : index
    %25 = vector.load %arg6[%c0_14, %c0_15] : memref<1x8xf32, #tpu.memory_space<vmem>>, vector<1x8xf32>
    tpu.vector_store %arg6[%c0_14, %c0_15], %24 {strides = array<i32>} : memref<1x8xf32, #tpu.memory_space<vmem>>, vector<1x8xf32>,
    return
  }
  func.func @transform_0(%arg0: i32) -> (i32, i32) {
    %c0_i32 = arith.constant 0 : i32
    %c0_i32_0 = arith.constant 0 : i32
    return %arg0, %c0_i32 : i32, i32
  }
  func.func @transform_1(%arg0: i32) -> (i32, i32) {
    %c0_i32 = arith.constant 0 : i32
    %c0_i32_0 = arith.constant 0 : i32
    %c0_i32_1 = arith.constant 0 : i32
    return %c0_i32, %c0_i32_0 : i32, i32
  }
  func.func @transform_2(%arg0: i32) -> (i32, i32) {
    %c0_i32 = arith.constant 0 : i32
    %c0_i32_0 = arith.constant 0 : i32
    %c0_i32_1 = arith.constant 0 : i32
    return %c0_i32, %c0_i32_0 : i32, i32
  }
  func.func @transform_3(%arg0: i32) -> (i32, i32) {
    %c0_i32 = arith.constant 0 : i32
    %c0_i32_0 = arith.constant 0 : i32
    %c0_i32_1 = arith.constant 0 : i32
    return %c0_i32, %c0_i32_0 : i32, i32
  }
  func.func @transform_4(%arg0: i32) -> i32 {
    %c0_i32 = arith.constant 0 : i32
    %c0_i32_0 = arith.constant 0 : i32
    return %c0_i32 : i32
  }
  func.func @transform_5(%arg0: i32) -> (i32, i32) {
    %c0_i32 = arith.constant 0 : i32
    %c0_i32_0 = arith.constant 0 : i32
    return %c0_i32, %arg0 : i32, i32
  }
}

</mosaic_0001>

<bundles_post_ra>
// kernel: v_value_net_forward.1
= control target key start
LH: loop header
LB: loop body
LE: loop exit
PB: predicated region body
PF: predicated region fallthrough
CT: control target
= control target key end

     0   :  { %11 = vsyncpa [#allocation4], 0  ;;  %s720_s0 = inlined_call_operand.hbm [shape: f32[8,32], index: 0, kind: input, shape index: {}]   ;;  %s721_s1 = inlined_call_operand.hbm [shape: bf16[32,256], index: 1, kind: input, shape index: {}]   ;;  %s722_s2 = inlined_call_operand.hbm [shape: bf16[256,256], index: 2, kind: input, shape index: {}]   ;;  %s723_s3 = inlined_call_operand.hbm [shape: f32[3,256], index: 3, kind: input, shape index: {}]   ;;  %s724_s4 = inlined_call_operand.<no memory space> [shape: f32[1], index: 4, kind: input, shape index: {}]   ;;  %s725_s5 = inlined_call_operand.hbm [shape: f32[1,8], index: 5, kind: output, shape index: {}]  }
   0x1   :  { %12 = vsyncpa [#allocation7], 0 }
   0x2   :  { %13 = vsyncpa [#allocation10], 0 }
   0x3   :  { %14 = vsyncpa [#allocation5], 0  ;;  %s664_s18 = smov [#allocation6]  }
   0x4   :  { %s30_s19 = sshll.u32 %s664_s18, 4  ;;  %s31_s19 = int_to_ptr.vmem [resolvable:$true] %s30_s19 }
   0x5   :  { %s564_s20 = scalar_lea.vmem %s31_s19, 512  ;;  %p569_p1 = scmp.lt.s32.totalorder %s31_s19, %s31_s19 }
   0x6   :  { %p565_p0 = scmp.ne.s32.totalorder %s31_s19, %s564_s20  ;;  %p570_p2 = scmp.lt.s32.totalorder %s564_s20, %s564_s20 }
   0x8   :  { %p571_p3 = por %p570_p2, %p569_p1 }
   0xa   :  { %p572_p4 = pnand %p571_p3, %p565_p0 }
   0xc   :  { %575 = shalt.err (!%p572_p4)
}
   0xd   :  { %s665_s21 = smov 128   ;;  %s666_s22 = smov 8  }
   0xe   :  { %36 = dma.hbm_to_vmem [thread:$0]  %s721_s1, 512, %s31_s19, [#allocation7], %s665_s21, %s665_s21, %s666_s22  }
   0xf   :  { %s667_s25 = smov [#allocation3]   ;;  %s668_s27 = smov [#allocation8]  }
  0x10   :  { %s21_s26 = sshll.u32 %s667_s25, 4  ;;  %s42_s28 = sshll.u32 %s668_s27, 4  ;;  %s22_s26 = int_to_ptr.vmem [resolvable:$true] %s21_s26  ;;  %s43_s28 = int_to_ptr.vmem [resolvable:$true] %s42_s28 }
  0x11   :  { %s584_s29 = scalar_lea.vmem %s22_s26, 128  ;;  %p589_p6 = scmp.lt.s32.totalorder %s22_s26, %s22_s26 }
  0x12   :  { %p585_p5 = scmp.ne.s32.totalorder %s22_s26, %s584_s29  ;;  %p590_p7 = scmp.lt.s32.totalorder %s584_s29, %s584_s29 }
  0x14   :  { %p591_p8 = por %p590_p7, %p589_p6 }
  0x16   :  { %p592_p9 = pnand %p591_p8, %p585_p5 }
  0x18   :  { %595 = shalt.err (!%p592_p9)
}
  0x19   :  { %24 = dma.hbm_to_vmem [thread:$0]  %s720_s0, 128, %s22_s26, [#allocation4]  }
  0x1a   :  { %s604_s7 = scalar_lea.vmem %s43_s28, 4096  ;;  %p609_p11 = scmp.lt.s32.totalorder %s43_s28, %s43_s28 }
  0x1b   :  { %p605_p10 = scmp.ne.s32.totalorder %s43_s28, %s604_s7  ;;  %p610_p12 = scmp.lt.s32.totalorder %s604_s7, %s604_s7 }
  0x1d   :  { %p611_p13 = por %p610_p12, %p609_p11 }
  0x1f   :  { %p612_p0 = pnand %p611_p13, %p605_p10 }
  0x21   :  { %615 = shalt.err (!%p612_p0)
}
  0x22   :  { %48 = dma.hbm_to_vmem [thread:$0]  %s722_s2, 4096, %s43_s28, [#allocation7], %s665_s21, %s665_s21, %s666_s22  }
  0x23   :  { %s669_s9 = smov [#allocation9]  }
  0x24   :  { %s55_s10 = sshll.u32 %s669_s9, 4  ;;  %s56_s10 = int_to_ptr.vmem [resolvable:$true] %s55_s10 }
  0x25   :  { %s624_s11 = scalar_lea.vmem %s56_s10, 128  ;;  %p629_p2 = scmp.lt.s32.totalorder %s56_s10, %s56_s10 }
  0x26   :  { %p625_p1 = scmp.ne.s32.totalorder %s56_s10, %s624_s11  ;;  %p630_p3 = scmp.lt.s32.totalorder %s624_s11, %s624_s11 }
  0x28   :  { %p631_p4 = por %p630_p3, %p629_p2 }
  0x2a   :  { %p632_p5 = pnand %p631_p4, %p625_p1 }
  0x2c   :  { %635 = shalt.err (!%p632_p5)
}
  0x2d   :  { %58 = dma.hbm_to_vmem [thread:$0]  %s723_s3, 128, %s56_s10, [#allocation10]  }
  0x2e   :  { %656 = dma.done.wait [#allocation4], 128  }
  0x2f   :  { %657 = vsyncadd [#allocation4], 4294967168 }
  0x30   :  { %658 = dma.done.wait [#allocation7], 4608  }
  0x31   :  { %659 = vsyncadd [#allocation7], 4294962688 }
  0x32   :  { %660 = dma.done.wait [#allocation10], 128  }
  0x33   :  { %661 = vsyncadd [#allocation10], 4294967168  ;;  %v670_v0 = vmov 0   ;;  %v502_v1 = vld [vmem:[#allocation6 + $0x14] ss:$8 sps:$4 sm:$0xff]   ;;  %vm116_vm0 = vcmask 261120   ;;  %v86_v39 = vlaneseq }
  0x34   :  { %152 = vmatprep.mubr.bf16.mxu0 %v670_v0  ;;  %v504_v2 = vld [vmem:[#allocation6 + $0x10] ss:$8 sps:$4 sm:$0xff]   ;;  %132 = vmatprep.subr.bf16.mxu0 %v502_v1  ;;  %v505_v3 = vld [vmem:[#allocation6 + $0x4] ss:$8 sps:$4 sm:$0xff]   ;;  %v507_v4 = vld [vmem:[#allocation6] ss:$8 sps:$4 sm:$0xff]  }
  0x35   :  { %v74_v5 = vld [vmem:[#allocation3] sm:$0xff]  ;;  %133 = vmatpush1.bf16.msra.mxu0 %v504_v2  ;;  %v511_v8 = vld [vmem:[#allocation8 + $0x64] ss:$8 sps:$4 sm:$0xff]   ;;  %v513_v10 = vld [vmem:[#allocation8 + $0x60] ss:$8 sps:$4 sm:$0xff]   ;;  %v87_v40 = vshrl.u32 %v86_v39, 7 }
  0x36   :  { %v508_v6 = vld [vmem:[#allocation8 + $0x74] ss:$8 sps:$4 sm:$0xff]   ;;  %134 = vmatprep.subr.bf16.mxu0 %v505_v3  ;;  %v510_v7 = vld [vmem:[#allocation8 + $0x70] ss:$8 sps:$4 sm:$0xff]   ;;  %v75_v9 = vpack.c.bf16 %v74_v5, %v74_v5  ;;  %v517_v13 = vld [vmem:[#allocation8 + $0x44] ss:$8 sps:$4 sm:$0xff]  }
  0x37   :  { %368 = vmatprep.subr.bf16.mxu1 %v508_v6  ;;  %v514_v11 = vld [vmem:[#allocation8 + $0x54] ss:$8 sps:$4 sm:$0xff]   ;;  %v516_v12 = vld [vmem:[#allocation8 + $0x50] ss:$8 sps:$4 sm:$0xff]   ;;  %v519_v14 = vld [vmem:[#allocation8 + $0x40] ss:$8 sps:$4 sm:$0xff]  }
  0x38   :  { %369 = vmatpush1.bf16.msra.mxu1 %v510_v7  ;;  %v520_v15 = vld [vmem:[#allocation8 + $0x34] ss:$8 sps:$4 sm:$0xff]   ;;  %v522_v16 = vld [vmem:[#allocation8 + $0x30] ss:$8 sps:$4 sm:$0xff]   ;;  %v523_v17 = vld [vmem:[#allocation8 + $0x24] ss:$8 sps:$4 sm:$0xff]  }
  0x39   :  { %135 = vmatpush1.bf16.msra.mxu0 %v507_v4  ;;  %370 = vmatprep.subr.bf16.mxu1 %v511_v8  ;;  %v525_v18 = vld [vmem:[#allocation8 + $0x20] ss:$8 sps:$4 sm:$0xff]   ;;  %v526_v19 = vld [vmem:[#allocation8 + $0x14] ss:$8 sps:$4 sm:$0xff]   ;;  %v528_v20 = vld [vmem:[#allocation8 + $0x10] ss:$8 sps:$4 sm:$0xff]  }
  0x3a   :  { %v529_v21 = vld [vmem:[#allocation8 + $0x4] ss:$8 sps:$4 sm:$0xff]   ;;  %v531_v22 = vld [vmem:[#allocation8] ss:$8 sps:$4 sm:$0xff]   ;;  %v532_v23 = vld [vmem:[#allocation8 + $0xf4] ss:$8 sps:$4 sm:$0xff]  }
  0x3b   :  { %v534_v24 = vld [vmem:[#allocation8 + $0xf0] ss:$8 sps:$4 sm:$0xff]   ;;  %v535_v25 = vld [vmem:[#allocation8 + $0xe4] ss:$8 sps:$4 sm:$0xff]   ;;  %v537_v26 = vld [vmem:[#allocation8 + $0xe0] ss:$8 sps:$4 sm:$0xff]  }
  0x3c   :  { %461 = vmatmul.mubr.msk.bf16.vlgmr.msra.gmra.mxu0 %vm116_vm0, %v75_v9  ;;  %371 = vmatpush1.bf16.msra.mxu1 %v513_v10  ;;  %v538_v27 = vld [vmem:[#allocation8 + $0xd4] ss:$8 sps:$4 sm:$0xff]   ;;  %v540_v28 = vld [vmem:[#allocation8 + $0xd0] ss:$8 sps:$4 sm:$0xff]   ;;  %v541_v29 = vld [vmem:[#allocation8 + $0xc4] ss:$8 sps:$4 sm:$0xff]   ;;  %v428_v10 = vstv %s724_s4 }
  0x3d   :  { %372 = vmatprep.subr.bf16.mxu1 %v514_v11  ;;  %v543_v30 = vld [vmem:[#allocation8 + $0xc0] ss:$8 sps:$4 sm:$0xff]   ;;  %v544_v31 = vld [vmem:[#allocation8 + $0xb4] ss:$8 sps:$4 sm:$0xff]   ;;  %v546_v32 = vld [vmem:[#allocation8 + $0xb0] ss:$8 sps:$4 sm:$0xff]  }
  0x3e   :  { %v547_v33 = vld [vmem:[#allocation8 + $0xa4] ss:$8 sps:$4 sm:$0xff]   ;;  %v549_v34 = vld [vmem:[#allocation8 + $0xa0] ss:$8 sps:$4 sm:$0xff]   ;;  %v550_v35 = vld [vmem:[#allocation8 + $0x94] ss:$8 sps:$4 sm:$0xff]  }
  0x3f   :  { %v552_v36 = vld [vmem:[#allocation8 + $0x90] ss:$8 sps:$4 sm:$0xff]   ;;  %v553_v37 = vld [vmem:[#allocation8 + $0x84] ss:$8 sps:$4 sm:$0xff]   ;;  %v555_v38 = vld [vmem:[#allocation8 + $0x80] ss:$8 sps:$4 sm:$0xff]  }
  0x40   :  { %373 = vmatpush1.bf16.msra.mxu1 %v516_v12  ;;  %v88_v41 = vsub.s32 0, %v87_v40  ;;  %v76_v42 = vld [vmem:[#allocation9] ss:$4 sm:$0x3]  ;;  %v92_v43 = vsub.s32 1, %v87_v40  ;;  %v432_v9 = vand.u32 127, %v86_v39 }
  0x41   :  { %374 = vmatprep.subr.bf16.mxu1 %v517_v13  ;;  %v78_v56 = vld [vmem:[#allocation9 + $0x1] ss:$4 sm:$0x3]  ;;  %v80_v60 = vld [vmem:[#allocation9 + $0x2] ss:$4 sm:$0x3] }
  0x42   :  { %v89_v44 = vrot.slane %v76_v42, %v88_v41  ;;  %v93_v45 = vrot.slane %v76_v42, %v92_v43  ;;  %v201_v57 = vrot.slane %v78_v56, %v88_v41  ;;  %v205_v58 = vrot.slane %v78_v56, %v92_v43  ;;  %s671_s13 = smov [#allocation11]  }
  0x43   :  { %v415_v1 = vrot.slane %v80_v60, %v88_v41  ;;  %v419_v2 = vrot.slane %v80_v60, %v92_v43  ;;  %v435_v11 = vsub.s32 %v432_v9, %v87_v40  ;;  %s446_s14 = sshll.u32 %s671_s13, 4  ;;  %vm438_vm1 = vcmask 57344   ;;  %s447_s14 = int_to_ptr.vmem [resolvable:$true] %s446_s14 }
  0x44   :  { %375 = vmatpush1.bf16.msra.mxu1 %v519_v14  ;;  %s636_s15 = scalar_lea.vmem %s447_s14, 16  ;;  %s640_s16 = scalar_lea.vmem %s447_s14, 32 }
  0x45   :  { %376 = vmatprep.subr.bf16.mxu1 %v520_v15  ;;  %p637_p6 = scmp.ne.s32.totalorder %s447_s14, %s636_s15  ;;  %p641_p7 = scmp.lt.s32.totalorder %s447_s14, %s447_s14 }
  0x46   :  { %p642_p8 = scmp.lt.s32.totalorder %s640_s16, %s636_s15 }
  0x48   :  { %377 = vmatpush1.bf16.msra.mxu1 %v522_v16  ;;  %p643_p9 = por %p642_p8, %p641_p7 }
  0x49   :  { %378 = vmatprep.subr.bf16.mxu1 %v523_v17 }
  0x4a   :  { %p644_p10 = pnand %p643_p9, %p637_p6 }
  0x4c   :  { %379 = vmatpush1.bf16.msra.mxu1 %v525_v18 }
  0x4d   :  { %380 = vmatprep.subr.bf16.mxu1 %v526_v19 }
  0x50   :  { %381 = vmatpush1.bf16.msra.mxu1 %v528_v20 }
  0x51   :  { %382 = vmatprep.subr.bf16.mxu1 %v529_v21 }
  0x54   :  { %383 = vmatpush1.bf16.msra.mxu1 %v531_v22 }
  0x55   :  { %384 = vmatprep.subr.bf16.mxu1 %v532_v23 }
  0x58   :  { %385 = vmatpush2.bf16.msra.mxu1 %v534_v24 }
  0x59   :  { %386 = vmatprep.subr.bf16.mxu1 %v535_v25 }
  0x5c   :  { %387 = vmatpush2.bf16.msra.mxu1 %v537_v26 }
  0x5d   :  { %388 = vmatprep.subr.bf16.mxu1 %v538_v27 }
  0x60   :  { %389 = vmatpush2.bf16.msra.mxu1 %v540_v28 }
  0x61   :  { %390 = vmatprep.subr.bf16.mxu1 %v541_v29 }
  0x64   :  { %391 = vmatpush2.bf16.msra.mxu1 %v543_v30 }
  0x65   :  { %392 = vmatprep.subr.bf16.mxu1 %v544_v31 }
  0x68   :  { %393 = vmatpush2.bf16.msra.mxu1 %v546_v32 }
  0x69   :  { %394 = vmatprep.subr.bf16.mxu1 %v547_v33 }
  0x6c   :  { %395 = vmatpush2.bf16.msra.mxu1 %v549_v34 }
  0x6d   :  { %396 = vmatprep.subr.bf16.mxu1 %v550_v35 }
  0x70   :  { %397 = vmatpush2.bf16.msra.mxu1 %v552_v36 }
  0x71   :  { %398 = vmatprep.subr.bf16.mxu1 %v553_v37 }
  0x74   :  { %399 = vmatpush2.bf16.msra.mxu1 %v555_v38 }
  0xfc   :  { %v154_v46 = vpop.f32.mrf.mxu0 }
  0xfd   :  { %v155_v47 = vadd.f32 %v154_v46, %v89_v44 }
  0xfe   :  { %v156_v48 = vpop.f32.mrf.mxu0 }
  0xff   :  { %v157_v49 = vadd.f32 %v156_v48, %v93_v45  ;;  %v161_v50 = vmax.f32 %v155_v47, 0.0 }
 0x100   :  { %v158_v51 = vpop.f32.mrf.mxu0 }
 0x101   :  { %v162_v52 = vmax.f32 %v157_v49, 0.0  ;;  %v163_v55 = vpack.c.bf16 %v161_v50, %v161_v50 }
 0x102   :  { %v159_v53 = vpop.f32.mrf.mxu0 }
 0x103   :  { %v164_v54 = vpack.c.bf16 %v162_v52, %v162_v52 }
 0x105   :  { %400 = vmatprep.mubr.bf16.mxu1 %v164_v54 }
 0x106   :  { %401 = vmatmul.mubr.bf16.vlgmr.msra.gmra.mxu1 %v163_v55 }
 0x1c6   :  { %v402_v59 = vpop.f32.mrf.mxu1 }
 0x1c7   :  { %v403_v61 = vadd.f32 %v402_v59, %v201_v57 }
 0x1c8   :  { %v404_v62 = vpop.f32.mrf.mxu1 }
 0x1c9   :  { %v409_v63 = vmax.f32 %v403_v61, 0.0  ;;  %v405_v0 = vadd.f32 %v404_v62, %v205_v58 }
 0x1ca   :  { %v406_v3 = vpop.f32.mrf.mxu1 }
 0x1cb   :  { %v410_v4 = vmax.f32 %v405_v0, 0.0  ;;  %v422_v6 = vmul.f32 %v415_v1, %v409_v63 }
 0x1cc   :  { %v407_v5 = vpop.f32.mrf.mxu1 }
 0x1cd   :  { %v423_v7 = vmul.f32 %v419_v2, %v410_v4 }
 0x1cf   :  { %v424_v8 = vadd.f32 %v423_v7, %v422_v6 }
 0x1d1   :  { %425 = vadd.xlane.f32.xlu0 %v424_v8 }
 0x25a   :  { %v426_v12 = vpop.xlane.xlu0 %425 }
 0x25b   :  { %v429_v13 = vadd.f32 %v428_v10, %v426_v12 }
 0x25d   :  { %v436_v14 = vrot.slane %v429_v13, %v435_v11 }
 0x25f   :  { %439 = vst.msk [vmem:[#allocation11] sm:$0x1] %vm438_vm1, %v436_v14 }
 0x260   :  { %647 = shalt.err (!%p644_p10)
}
 0x261   :  { %449 = dma.vmem_to_hbm [thread:$0]  %s447_s14, 16, %s725_s5, [#allocation5]  }
 0x262   :  { %662 = dma.done.wait [#allocation5], 16  }
 0x263   :  { %663 = vsyncadd [#allocation5], 4294967280 }
 0x264   :  { %453 = vsyncpa [#allocation4], 1 }
 0x265   :  { %454 = vsyncpa [#allocation7], 1 }
 0x266   :  { %455 = vsyncpa [#allocation10], 1 }
 0x267   :  { %456 = vsyncpa [#allocation5], 1 }

</bundles_post_ra>
